<compile_context>
chip_gen: v6e
topology: v6e:2x2x1
jax: 0.10.0
libtpu: 0.0.40
codegen_flags: <defaults>
</compile_context>

<pallas_src>
import functools

import jax
import jax.numpy as jnp
from jax.experimental import pallas as pl
from jax.experimental.pallas import tpu as pltpu

_LANES = 128


def _partial_sum_8x128(vals):
    """Reduce a (tile_rows, 128) f32 block to an (8, 128) partial sum."""
    r = vals.shape[0]
    if r % 8 == 0:
        # Leading-axis reduce over whole vregs: pure VPU adds, no XLU traffic.
        return jnp.sum(vals.reshape(r // 8, 8, _LANES), axis=0)
    # Small / odd single-tile case: reduce along sublanes, park result in row 0.
    s = jnp.sum(vals, axis=0, keepdims=True)                       # (1, 128)
    rowid = jax.lax.broadcasted_iota(jnp.int32, (8, _LANES), 0)
    return jnp.where(rowid == 0, jnp.broadcast_to(s, (8, _LANES)), 0.0)


def _make_kernel(tile_rows, num_tiles, tail_valid):
    tile_elems = tile_rows * _LANES
    needs_mask = tail_valid < tile_elems   # static: padded lanes / ragged block exist

    def kernel(scal_ref, d_ref, et_ref, ct_ref, cens_ref, out_ref):
        inv_scale = scal_ref[0]            # precomputed 1/scale   (SMEM scalar)
        log_scale = scal_ref[1]            # precomputed log(scale)
        half_inv_scale = 0.5 * inv_scale

        set_ = et_ref[...] + d_ref[...]                  # shifted event times
        sct = ct_ref[...]                                # cov_times[:, 0]

        logpdf = jnp.log(set_) - log_scale - set_ * set_ * half_inv_scale
        logsurv = -(set_ * inv_scale)
        lognorm = -(sct * inv_scale)
        logprob = jnp.where(cens_ref[...] != 0, logsurv, logpdf) - lognorm

        def write_plain():
            out_ref[...] = _partial_sum_8x128(logprob)

        def write_masked():
            # Last tile only: zero padded lanes / ragged-block garbage.
            # SELECT (not multiply) so NaN/-inf in dead lanes cannot propagate.
            rowid = jax.lax.broadcasted_iota(jnp.int32, logprob.shape, 0)
            laneid = jax.lax.broadcasted_iota(jnp.int32, logprob.shape, 1)
            valid = rowid * _LANES + laneid < tail_valid
            out_ref[...] = _partial_sum_8x128(jnp.where(valid, logprob, 0.0))

        if not needs_mask:
            write_plain()                      # mask machinery fully elided
        elif num_tiles == 1:
            write_masked()
        else:
            last = num_tiles - 1
            pl.when(pl.program_id(0) != last)(write_plain)
            pl.when(pl.program_id(0) == last)(write_masked)

    return kernel


@functools.partial(jax.jit, static_argnames=("max_tile_rows",))
def rayleigh_logprob_constant_delta(deltas, event_times, cov_times,
                                    censoring_indicators, global_theta,
                                    *, max_tile_rows=2048):
    """deltas: (N, 1), event_times: (N,), cov_times: (N, T),
    censoring_indicators: (N,) bool/int, global_theta: (P,) with scale=theta[0].
    Returns scalar f32 mean log-prob."""
    n = event_times.shape[0]
    if n == 0:
        # Mean of an empty set — matches the reference's NaN behavior.
        return jnp.full((), jnp.nan, jnp.float32)

    # ---- wrapper glue: minimum number of copy passes -----------------------
    deltas_flat = deltas.reshape(n)                 # (N,1)->(N): layout-free
    if deltas_flat.dtype != jnp.float32:
        deltas_flat = deltas_flat.astype(jnp.float32)
    et = event_times
    if et.dtype != jnp.float32:
        et = et.astype(jnp.float32)
    ct0 = cov_times[:, 0]                           # (N,) strided slice (small copy)
    if ct0.dtype != jnp.float32:
        ct0 = ct0.astype(jnp.float32)
    cens = censoring_indicators
    if cens.dtype != jnp.int8:
        cens = cens.astype(jnp.int8)                # 1 B/elt on the wire

    # Hoisted scalar math: one divide + one log total, shipped via SMEM.
    scale = global_theta[0].astype(jnp.float32)
    scal = jnp.stack([1.0 / scale, jnp.log(scale)])            # (2,) f32

    # Pad only to the next multiple of 128 lanes (no pad at all if N%128==0).
    rows = -(-n // _LANES)
    pad = rows * _LANES - n
    if pad:
        deltas_flat = jnp.pad(deltas_flat, (0, pad))
        et = jnp.pad(et, (0, pad))
        ct0 = jnp.pad(ct0, (0, pad))
        cens = jnp.pad(cens, (0, pad))

    d2 = deltas_flat.reshape(rows, _LANES)
    et2 = et.reshape(rows, _LANES)
    ct2 = ct0.reshape(rows, _LANES)
    cens2 = cens.reshape(rows, _LANES)

    # Tile sizing: either one full-array block, or max_tile_rows (multiple of
    # 32 for the int8 stream) with a ragged last block handled by the mask.
    max_tile_rows = max(32, (max_tile_rows // 32) * 32)
    if rows <= max_tile_rows:
        tile_rows = rows
        num_tiles = 1
    else:
        tile_rows = max_tile_rows
        num_tiles = -(-rows // tile_rows)
    tail_valid = n - (num_tiles - 1) * tile_rows * _LANES     # static int

    vec_spec = pl.BlockSpec((tile_rows, _LANES), lambda i, s: (i, 0))

    partials = pl.pallas_call(
        _make_kernel(tile_rows, num_tiles, tail_valid),
        out_shape=jax.ShapeDtypeStruct((num_tiles * 8, _LANES), jnp.float32),
        grid_spec=pltpu.PrefetchScalarGridSpec(
            num_scalar_prefetch=1,                   # scal -> SMEM
            grid=(num_tiles,),
            in_specs=[vec_spec,                      # deltas
                      vec_spec,                      # event_times
                      vec_spec,                      # cov_times[:, 0]
                      vec_spec],                     # censoring (int8)
            out_specs=pl.BlockSpec((8, _LANES), lambda i, s: (i, 0)),
        ),
        compiler_params=pltpu.CompilerParams(
            dimension_semantics=("parallel",)),      # lets v7x use both TCs
    )(scal, d2, et2, ct2, cens2)

    # Tiny final reduce + mean over the TRUE sample count in plain JAX.
    return jnp.sum(partials) / jnp.float32(n)


def _reference(deltas, event_times, cov_times, censoring_indicators,
               global_theta):
    scale = global_theta[0]
    set_ = event_times + deltas.reshape(-1)
    sct = cov_times[:, 0]
    logpdf = jnp.log(set_) - jnp.log(scale) - set_ ** 2 / (2.0 * scale)
    logsurv = -(set_ / scale)
    lognorm = -(sct / scale)
    logprob = jnp.where(censoring_indicators.astype(bool), logsurv, logpdf)
    return jnp.mean(logprob - lognorm)


def _make_inputs(key, n, t):
    k1, k2, k3, k4 = jax.random.split(key, 4)
    event_times = jax.random.uniform(k1, (n,), jnp.float32, minval=0.5, maxval=5.0)
    deltas = jax.random.uniform(k2, (n, 1), jnp.float32, minval=0.1, maxval=1.0)
    cov_times = jax.random.uniform(k3, (n, t), jnp.float32, minval=0.0, maxval=3.0)
    cens = (jax.random.uniform(k4, (n,)) > 0.5)
    theta = jnp.array([2.0, 0.5], dtype=jnp.float32)   # scale = theta[0]
    return deltas, event_times, cov_times, cens, theta


if __name__ == "__main__":
    key = jax.random.PRNGKey(0)

    # Primary small test (N multiple of 128 -> zero-copy wrapper path).
    args = _make_inputs(key, 256, 8)
    result = jax.block_until_ready(rayleigh_logprob_constant_delta(*args))
    ref = _reference(*args)
    assert jnp.allclose(result, ref, rtol=1e-4, atol=1e-4), (result, ref)

    # Ragged-N test (exercises the 128-lane pad + tail mask path).
    args2 = _make_inputs(jax.random.PRNGKey(1), 200, 8)
    result2 = jax.block_until_ready(rayleigh_logprob_constant_delta(*args2))
    ref2 = _reference(*args2)
    assert jnp.allclose(result2, ref2, rtol=1e-4, atol=1e-4), (result2, ref2)

    # Multi-tile + ragged last block test (forced small tiles).
    args3 = _make_inputs(jax.random.PRNGKey(2), 128 * 80 + 37, 4)
    result3 = jax.block_until_ready(
        rayleigh_logprob_constant_delta(*args3, max_tile_rows=32))
    ref3 = _reference(*args3)
    assert jnp.allclose(result3, ref3, rtol=1e-4, atol=1e-4), (result3, ref3)

    print("KERNEL_OK")
</pallas_src>

<mosaic_0001>
module attributes {stable_mosaic.version = 11 : i64} {
  func.func @kernel(%arg0: i32, %arg1: memref<2xf32, #tpu.memory_space<smem>>, %arg2: memref<2x128xf32, #tpu.memory_space<vmem>>, %arg3: memref<2x128xf32, #tpu.memory_space<vmem>>, %arg4: memref<2x128xf32, #tpu.memory_space<vmem>>, %arg5: memref<2x128xi8, #tpu.memory_space<vmem>>, %arg6: memref<8x128xf32, #tpu.memory_space<vmem>>) attributes {dimension_semantics = [#tpu.dimension_semantics<parallel>], iteration_bounds = array<i64: 1>, scalar_prefetch = 1 : i64, scratch_operands = 0 : i64, tpu.core_type = #tpu.core_type<tc>, window_params = [{transform_indices = @transform_0, window_bounds = array<i64: 2, 128>}, {transform_indices = @transform_1, window_bounds = array<i64: 2, 128>}, {transform_indices = @transform_2, window_bounds = array<i64: 2, 128>}, {transform_indices = @transform_3, window_bounds = array<i64: 2, 128>}, {transform_indices = @transform_4, window_bounds = array<i64: 8, 128>}]} {
    %c0 = arith.constant 0 : index
    %0 = memref.load %arg1[%c0] : memref<2xf32, #tpu.memory_space<smem>>
    %c1 = arith.constant 1 : index
    %1 = memref.load %arg1[%c1] : memref<2xf32, #tpu.memory_space<smem>>
    %cst = arith.constant 5.000000e-01 : f32
    %2 = arith.mulf %cst, %0 : f32
    %c0_0 = arith.constant 0 : index
    %c0_1 = arith.constant 0 : index
    %3 = vector.load %arg3[%c0_0, %c0_1] : memref<2x128xf32, #tpu.memory_space<vmem>>, vector<2x128xf32>
    %c0_2 = arith.constant 0 : index
    %c0_3 = arith.constant 0 : index
    %4 = vector.load %arg2[%c0_2, %c0_3] : memref<2x128xf32, #tpu.memory_space<vmem>>, vector<2x128xf32>
    %5 = arith.addf %3, %4 : vector<2x128xf32>
    %c0_4 = arith.constant 0 : index
    %c0_5 = arith.constant 0 : index
    %6 = vector.load %arg4[%c0_4, %c0_5] : memref<2x128xf32, #tpu.memory_space<vmem>>, vector<2x128xf32>
    %7 = math.log %5 : vector<2x128xf32>
    %8 = vector.broadcast %1 : f32 to vector<2x128xf32>
    %9 = arith.subf %7, %8 : vector<2x128xf32>
    %10 = arith.mulf %5, %5 : vector<2x128xf32>
    %11 = vector.broadcast %2 : f32 to vector<2x128xf32>
    %12 = arith.mulf %10, %11 : vector<2x128xf32>
    %13 = arith.subf %9, %12 : vector<2x128xf32>
    %14 = vector.broadcast %0 : f32 to vector<2x128xf32>
    %15 = arith.mulf %5, %14 : vector<2x128xf32>
    %cst_6 = arith.constant 0.000000e+00 : f32
    %16 = vector.broadcast %cst_6 : f32 to vector<2x128xf32>
    %17 = arith.subf %16, %15 : vector<2x128xf32>
    %18 = vector.broadcast %0 : f32 to vector<2x128xf32>
    %19 = arith.mulf %6, %18 : vector<2x128xf32>
    %cst_7 = arith.constant 0.000000e+00 : f32
    %20 = vector.broadcast %cst_7 : f32 to vector<2x128xf32>
    %21 = arith.subf %20, %19 : vector<2x128xf32>
    %c0_8 = arith.constant 0 : index
    %c0_9 = arith.constant 0 : index
    %22 = vector.load %arg5[%c0_8, %c0_9] : memref<2x128xi8, #tpu.memory_space<vmem>>, vector<2x128xi8>
    %c0_i8 = arith.constant 0 : i8
    %23 = vector.broadcast %c0_i8 : i8 to vector<2x128xi8>
    %24 = arith.cmpi ne, %22, %23 : vector<2x128xi8>
    %25 = arith.select %24, %17, %13 : vector<2x128xi1>, vector<2x128xf32>
    %26 = arith.subf %25, %21 : vector<2x128xf32>
    %cst_10 = arith.constant dense<0.000000e+00> : vector<128xf32>
    %27 = vector.multi_reduction <add>, %26, %cst_10 [0] : vector<2x128xf32> to vector<128xf32>
    %28 = vector.shape_cast %27 : vector<128xf32> to vector<1x128xf32>
    %29 = tpu.iota {dimensions = array<i32: 0>} : vector<8x128xi32>
    %c0_i32 = arith.constant 0 : i32
    %30 = vector.broadcast %c0_i32 : i32 to vector<8x128xi32>
    %31 = arith.cmpi eq, %29, %30 : vector<8x128xi32>
    %32 = vector.shape_cast %28 : vector<1x128xf32> to vector<1x128xf32>
    %33 = vector.broadcast %32 : vector<1x128xf32> to vector<8x128xf32>
    %cst_11 = arith.constant 0.000000e+00 : f32
    %34 = vector.broadcast %cst_11 : f32 to vector<8x128xf32>
    %35 = arith.select %31, %33, %34 : vector<8x128xi1>, vector<8x128xf32>
    %c0_12 = arith.constant 0 : index
    %c0_13 = arith.constant 0 : index
    %36 = vector.load %arg6[%c0_12, %c0_13] : memref<8x128xf32, #tpu.memory_space<vmem>>, vector<8x128xf32>
    tpu.vector_store %arg6[%c0_12, %c0_13], %35 {strides = array<i32>} : memref<8x128xf32, #tpu.memory_space<vmem>>, vector<8x128xf32>,
    return
  }
  func.func @transform_0(%arg0: i32, %arg1: memref<2xf32, #tpu.memory_space<smem>>) -> (i32, i32) {
    %c0_i32 = arith.constant 0 : i32
    %c0_i32_0 = arith.constant 0 : i32
    return %arg0, %c0_i32 : i32, i32
  }
  func.func @transform_1(%arg0: i32, %arg1: memref<2xf32, #tpu.memory_space<smem>>) -> (i32, i32) {
    %c0_i32 = arith.constant 0 : i32
    %c0_i32_0 = arith.constant 0 : i32
    return %arg0, %c0_i32 : i32, i32
  }
  func.func @transform_2(%arg0: i32, %arg1: memref<2xf32, #tpu.memory_space<smem>>) -> (i32, i32) {
    %c0_i32 = arith.constant 0 : i32
    %c0_i32_0 = arith.constant 0 : i32
    return %arg0, %c0_i32 : i32, i32
  }
  func.func @transform_3(%arg0: i32, %arg1: memref<2xf32, #tpu.memory_space<smem>>) -> (i32, i32) {
    %c0_i32 = arith.constant 0 : i32
    %c0_i32_0 = arith.constant 0 : i32
    return %arg0, %c0_i32 : i32, i32
  }
  func.func @transform_4(%arg0: i32, %arg1: memref<2xf32, #tpu.memory_space<smem>>) -> (i32, i32) {
    %c0_i32 = arith.constant 0 : i32
    %c0_i32_0 = arith.constant 0 : i32
    return %arg0, %c0_i32 : i32, i32
  }
}

</mosaic_0001>

<bundles_post_ra>
// kernel: rayleigh_logprob_constant_delta.1
= control target key start
LH: loop header
LB: loop body
LE: loop exit
PB: predicated region body
PF: predicated region fallthrough
CT: control target
= control target key end

     0   :  { %s139_s0 = inlined_call_operand.vmem [shape: f32[2], index: 0, kind: input, shape index: {}]   ;;  %s140_s1 = inlined_call_operand.vmem [shape: f32[2,128], index: 1, kind: input, shape index: {}]   ;;  %s141_s2 = inlined_call_operand.vmem [shape: f32[2,128], index: 2, kind: input, shape index: {}]   ;;  %s142_s3 = inlined_call_operand.vmem [shape: f32[2,128], index: 3, kind: input, shape index: {}]   ;;  %s143_s4 = inlined_call_operand.vmem [shape: s8[2,128], index: 4, kind: input, shape index: {}]   ;;  %s144_s5 = inlined_call_operand.vmem [shape: f32[8,128], index: 5, kind: output, shape index: {}]  }
   0x1   :  { %s10_s20 = sshll.u32 %s139_s0, 4  ;;  %s11_s20 = int_to_ptr.vmem [resolvable:$true] %s10_s20 }
   0x2   :  { %s75_s21 = scalar_lea.vmem %s11_s20, 16  ;;  %p80_p1 = scmp.lt.s32.totalorder %s11_s20, %s11_s20 }
   0x3   :  { %p76_p0 = scmp.ne.s32.totalorder %s11_s20, %s75_s21  ;;  %p81_p2 = scmp.lt.s32.totalorder %s75_s21, %s75_s21 }
   0x5   :  { %p82_p3 = por %p81_p2, %p80_p1 }
   0x7   :  { %p83_p4 = pnand %p82_p3, %p76_p0 }
   0x9   :  { %86 = shalt.err (!%p83_p4)  }
   0xa   :  { %s89_s22 = smov [#allocation3]  }
   0xb   :  { %13 = dma.vmem_to_smem %s11_s20, 16, %s89_s22, [#allocation2] }
   0xc   :  { %87 = dma.done.wait [#allocation2], 16 }
   0xd   :  { %88 = vsyncadd [#allocation2], 4294967280 }
   0xe   :  { %15 = sfence }
   0xf   :  { %v29_v0 = vld [vmem:[%s141_s2] sm:$0x3]  ;;  %s26_s0 = sld [smem:[#allocation3]]  ;;  %v90_v7 = vmov 0   ;;  %vm53_vm2 = vcmask 1041408   ;;  %v61_v25 = vlaneseq }
  0x10   :  { %v30_v1 = vld [vmem:[%s140_s1] sm:$0x3]  ;;  %s70_s29 = sld [smem:[#allocation3 + $0x1]] }
  0x11   :  { %v31_v2 = vadd.f32 %v30_v1, %v29_v0  ;;  %v46_v3 = vld [vmem:[%s143_s4] sm:$0x1]  ;;  %v62_v28 = vshrl.u32 %v61_v25, 7 }
  0x12   :  { %vm47_vm0 = vnez %v46_v3  ;;  %v32_v5 = vld [vmem:[%s142_s3] sm:$0x3] }
  0x13   :  { %73 = vlog2.f32 %v31_v2  ;;  %v37_v6 = vmul.f32 %v31_v2, %v31_v2  ;;  %v48_v8 = vsel %vm47_vm0, 16843009, %v90_v7  ;;  %vm63_vm3 = vcmp.eq.s32.totalorder %v62_v28, 0 }
  0x14   :  { %v49_v14 = vunpack.c.0.s8 %v48_v8 }
  0x15   :  { %s28_s30 = smul.f32 0.5, %s26_s0  ;;  %v41_v4 = vstv %s26_s0 }
  0x16   :  { %v42_v10 = vmul.f32 %v41_v4, %v31_v2  ;;  %v35_v12 = vstv %s70_s29  ;;  %v44_v13 = vmul.f32 %v41_v4, %v32_v5  ;;  %vm50_vm1 = vcmp.ne.s32.totalorder %v49_v14, 0 }
  0x17   :  { %v38_v9 = vstv %s28_s30 }
  0x18   :  { %v39_v16 = vmul.f32 %v38_v9, %v37_v6  ;;  %v43_v18 = vsub.f32 0.0, %v42_v10  ;;  %v45_v19 = vsub.f32 0.0, %v44_v13 }
  0x20   :  { %v74_v11 = vpop.eup %73 }
  0x21   :  { %v34_v15 = vmul.f32 0.6931472, %v74_v11 }
  0x23   :  { %v36_v17 = vsub.f32 %v34_v15, %v35_v12 }
  0x25   :  { %v40_v20 = vsub.f32 %v36_v17, %v39_v16 }
  0x27   :  { %v51_v21 = vsel %vm50_vm1, %v43_v18, %v40_v20 }
  0x28   :  { %v52_v22 = vsub.f32 %v51_v21, %v45_v19 }
  0x2a   :  { %v54_v23 = vsel %vm53_vm2, %v52_v22, 0.0 }
  0x2b   :  { %v55_v24 = vrot.slane %v54_v23, 4 }
  0x2d   :  { %v56_v26 = vadd.f32 %v55_v24, %v54_v23 }
  0x2f   :  { %v57_v27 = vrot.slane %v56_v26, 2 }
  0x31   :  { %v58_v29 = vadd.f32 %v57_v27, %v56_v26 }
  0x33   :  { %v59_v30 = vrot.slane %v58_v29, 1 }
  0x35   :  { %v60_v31 = vadd.f32 %v59_v30, %v58_v29 }
  0x37   :  { %v64_v32 = vsel %vm63_vm3, %v60_v31, 0.0 }
  0x38   :  { %65 = vst [vmem:[%s144_s5] sm:$0xff] %v64_v32 }

</bundles_post_ra>
